<compile_context>
chip_gen: v5e
topology: v5e:2x2
jax: 0.10.0
libtpu: 0.0.40
codegen_flags: <defaults>
</compile_context>

<pallas_src>
import jax
import jax.numpy as jnp
from jax.experimental import pallas as pl
from jax.experimental.pallas import tpu as pltpu


COMPUTE_DTYPE = jnp.bfloat16      # MXU operand dtype (f32 accumulation).
                                  # Set to jnp.float32 for bit-closer parity tests.
FRAME = 32                        # input spatial size (32x32)
LANES = FRAME * FRAME             # 1024 lanes per image


# --------------------------------------------------------------------------
# pltpu.roll direction probe -- resolved once at import time (outside any
# jit / pallas trace).  We need shift(v, s)[:, l] == v[:, l + s].
# --------------------------------------------------------------------------
def _probe_roll_kernel(x_ref, o_ref):
    o_ref[...] = pltpu.roll(x_ref[...], 1, 1)


def _resolve_roll_direction():
    x = jax.lax.broadcasted_iota(jnp.int32, (8, 128), 1)
    y = pl.pallas_call(
        _probe_roll_kernel,
        out_shape=jax.ShapeDtypeStruct((8, 128), jnp.int32),
    )(x)
    # jnp.roll semantics => out[0] = in[-1] = 127
    return bool(int(jax.device_get(y)[0, 0]) == 127)


_ROLL_LIKE_JNP = _resolve_roll_direction()


# --------------------------------------------------------------------------
# Fused forward kernel: one grid step == one image on a 1024-lane frame
# (channels on sublanes, flattened 32x32 frame on lanes).
# --------------------------------------------------------------------------
def _fused_cnn_kernel(x_ref, w1_ref, b1_ref, w2_ref, b2_ref, w3_ref, b3_ref,
                      wf1_ref, bf1_ref, wf2_ref, bf2_ref, o_ref,
                      cslab_ref, fslab_ref):
    cd = COMPUTE_DTYPE

    def shift(v, s):
        # y[:, l] = v[:, (l + s) mod L].  Valid output lanes never read a
        # wrapped lane (max valid read is lane 1023).
        L = v.shape[-1]
        s = s % L
        if s == 0:
            return v
        amt = (L - s) if _ROLL_LIKE_JNP else s
        return pltpu.roll(v, amt, 1)

    def conv5x5_im2col(act, w_ref, b_ref, dil, c):
        # act: [C, 1024] compute-dtype at frame dilation `dil`.
        # Write the im2col slab (row (i*5+j)*C + ch) then ONE K=25*C MXU dot.
        for k in range(25):
            i, j = divmod(k, 5)
            cslab_ref[k * c:(k + 1) * c, :] = shift(act, (32 * i + j) * dil)
        out = jnp.dot(w_ref[...], cslab_ref[:25 * c, :],
                      preferred_element_type=jnp.float32)
        return jnp.maximum(out + b_ref[...], 0.0)

    def maxpool2x2(act, dil):
        # 2x2 / stride-2 max pool; result stays in the frame at dilation 2*dil.
        return jnp.maximum(
            jnp.maximum(act, shift(act, dil)),
            jnp.maximum(shift(act, 32 * dil), shift(act, 33 * dil)))

    # ---- conv1 (3 -> 16): tiny K, kept as 25 small dots with f32 accumulate.
    x_bf = x_ref[...].astype(cd)                           # [3, 1024]
    cols = [shift(x_bf, j) for j in range(5)]
    a1 = None
    for i in range(5):
        inner = None
        for j in range(5):
            part = jnp.dot(w1_ref[i * 5 + j], cols[j],
                           preferred_element_type=jnp.float32)
            inner = part if inner is None else inner + part
        inner = shift(inner, 32 * i)                       # row shift (stride 32)
        a1 = inner if a1 is None else a1 + inner
    a1 = jnp.maximum(a1 + b1_ref[...], 0.0)                # [16,1024] 28x28 valid

    # ---- conv2 / pool / conv3 / pool: one big-K dot per conv.
    a2 = conv5x5_im2col(a1.astype(cd), w2_ref, b2_ref, dil=1, c=16)  # 24x24
    p1 = maxpool2x2(a2.astype(cd), dil=1)                  # [32,1024] 12x12 @ dil 2
    a3 = conv5x5_im2col(p1, w3_ref, b3_ref, dil=2, c=32)   # [64,1024]  8x8  @ dil 2
    p2 = maxpool2x2(a3.astype(cd), dil=2)                  # [64,1024]  4x4  @ dil 4

    # ---- fc1 (1024 -> 100): compact the 16 valid 4x4 positions to 128 lanes.
    # Feature (y=r, x=c, ch) sits at frame lane 128*r + 4*c of channel ch.
    for f in range(16):
        r, c = divmod(f, 4)
        fslab_ref[f * 64:(f + 1) * 64, :] = shift(p2, 128 * r + 4 * c)[:, :128]
    h = jnp.dot(wf1_ref[...], fslab_ref[...],
                preferred_element_type=jnp.float32)
    h = jnp.maximum(h + bf1_ref[...], 0.0)                 # [100,128] lane 0 valid

    # ---- fc2 (100 -> 10).
    logits = jnp.dot(wf2_ref[...], h.astype(cd),
                     preferred_element_type=jnp.float32) + bf2_ref[...]
    o_ref[...] = logits.astype(o_ref.dtype)                # [10,128] lane-dense store


# --------------------------------------------------------------------------
# Parameter init (Kaiming normal on torch-layout weights, zero biases),
# packed + pre-cast ONCE into the kernel's layouts.
# --------------------------------------------------------------------------
def kaiming_normal(key, shape, fan_in):
    return jax.random.normal(key, shape, jnp.float32) * jnp.sqrt(2.0 / fan_in)


def _pack_conv_w_taps(w):
    # torch [O, C, 5, 5] -> [25, O, C]   (kernel-position major; conv1 small dots)
    o, c, kh, kw = w.shape
    return w.transpose(2, 3, 0, 1).reshape(kh * kw, o, c).astype(COMPUTE_DTYPE)


def _pack_conv_w_im2col(w):
    # torch [O, C, 5, 5] -> [O, 25*C]; column index = (i*5+j)*C + c  (slab rows)
    o, c, kh, kw = w.shape
    return w.transpose(0, 2, 3, 1).reshape(o, kh * kw * c).astype(COMPUTE_DTYPE)


def _pack_fc1_w(w):
    # torch [100, 1024] (feature = ch*16 + y*4 + x) ->
    # [100, 1024] with column index = (y*4 + x)*64 + ch  (matches fc slab rows)
    out_f = w.shape[0]
    return (w.reshape(out_f, 64, 4, 4).transpose(0, 2, 3, 1)
            .reshape(out_f, 1024).astype(COMPUTE_DTYPE))


def init_params(key):
    ks = jax.random.split(key, 5)
    w1 = kaiming_normal(ks[0], (16, 3, 5, 5), 3 * 5 * 5)
    w2 = kaiming_normal(ks[1], (32, 16, 5, 5), 16 * 5 * 5)
    w3 = kaiming_normal(ks[2], (64, 32, 5, 5), 32 * 5 * 5)
    f1 = kaiming_normal(ks[3], (100, 1024), 1024)
    f2 = kaiming_normal(ks[4], (10, 100), 100)
    return {
        "w1": _pack_conv_w_taps(w1),     "b1": jnp.zeros((16, 1), jnp.float32),
        "w2": _pack_conv_w_im2col(w2),   "b2": jnp.zeros((32, 1), jnp.float32),
        "w3": _pack_conv_w_im2col(w3),   "b3": jnp.zeros((64, 1), jnp.float32),
        "wf1": _pack_fc1_w(f1),          "bf1": jnp.zeros((100, 1), jnp.float32),
        "wf2": f2.astype(COMPUTE_DTYPE), "bf2": jnp.zeros((10, 1), jnp.float32),
    }


# --------------------------------------------------------------------------
# Forward wrapper: one fused pallas_call, batch on the grid ("parallel").
# --------------------------------------------------------------------------
def forward(params, x):
    """x: [B, 3, 32, 32] float32 (NCHW) -> logits [B, 10]."""
    B = x.shape[0]
    xf = x.reshape(B, 3, LANES)          # free reshape; no HBM transpose

    names = ["w1", "b1", "w2", "b2", "w3", "b3", "wf1", "bf1", "wf2", "bf2"]
    weight_args = [params[n] for n in names]

    def const_spec(p):
        nd = p.ndim
        return pl.BlockSpec(p.shape, lambda b, _nd=nd: (0,) * _nd)

    out = pl.pallas_call(
        _fused_cnn_kernel,
        out_shape=jax.ShapeDtypeStruct((B, 10, 128), jnp.float32),
        grid=(B,),
        in_specs=[pl.BlockSpec((None, 3, LANES), lambda b: (b, 0, 0))]
                 + [const_spec(p) for p in weight_args],
        out_specs=pl.BlockSpec((None, 10, 128), lambda b: (b, 0, 0)),
        scratch_shapes=[
            pltpu.VMEM((800, LANES), COMPUTE_DTYPE),   # shared conv im2col slab
            pltpu.VMEM((1024, 128), COMPUTE_DTYPE),    # fc1 compacted slab
        ],
        compiler_params=pltpu.CompilerParams(
            dimension_semantics=("parallel",)),
    )(xf, *weight_args)

    # Each image's logits live in lane 0 of its [10, 128] block.
    return out[:, :, 0]


if __name__ == "__main__":
    key = jax.random.PRNGKey(0)
    k_params, k_x = jax.random.split(key)
    params = init_params(k_params)
    # Linear(1024, 100) after the conv stack forces a 32x32 input (CIFAR-like).
    x = jax.random.normal(k_x, (2, 3, 32, 32), dtype=jnp.float32)

    out = jax.block_until_ready(jax.jit(forward)(params, x))
    assert out.shape == (2, 10), out.shape
    print("KERNEL_OK")
</pallas_src>

<mosaic_0001>
module attributes {stable_mosaic.version = 11 : i64} {
  func.func @_probe_roll_kernel(%arg0: memref<8x128xi32, #tpu.memory_space<vmem>>, %arg1: memref<8x128xi32, #tpu.memory_space<vmem>>) attributes {dimension_semantics = [], scalar_prefetch = 0 : i64, scratch_operands = 0 : i64, tpu.core_type = #tpu.core_type<tc>} {
    %c0 = arith.constant 0 : index
    %c0_0 = arith.constant 0 : index
    %0 = vector.load %arg0[%c0, %c0_0] : memref<8x128xi32, #tpu.memory_space<vmem>>, vector<8x128xi32>
    %c1_i32 = arith.constant 1 : i32
    %1 = tpu.dynamic_rotate %0 by %c1_i32 dim 1 : vector<8x128xi32>, i32 -> vector<8x128xi32>
    %c0_1 = arith.constant 0 : index
    %c0_2 = arith.constant 0 : index
    %2 = vector.load %arg1[%c0_1, %c0_2] : memref<8x128xi32, #tpu.memory_space<vmem>>, vector<8x128xi32>
    tpu.vector_store %arg1[%c0_1, %c0_2], %1 {strides = array<i32>} : memref<8x128xi32, #tpu.memory_space<vmem>>, vector<8x128xi32>,
    return
  }
}

</mosaic_0001>

<bundles_post_ra>
// kernel: tpu_custom_call.1
= control target key start
LH: loop header
LB: loop body
LE: loop exit
PB: predicated region body
PF: predicated region fallthrough
CT: control target
= control target key end

     0   :  { %6 = vsyncpa [#allocation3], 0  ;;  %s118_s0 = inlined_call_operand.hbm [shape: s32[8,128], index: 0, kind: input, shape index: {}]   ;;  %s119_s1 = inlined_call_operand.hbm [shape: s32[8,128], index: 1, kind: output, shape index: {}]  }
   0x1   :  { %7 = vsyncpa [#allocation4], 0  ;;  %s13_s8 = sshll.u32 %s118_s0, 4  ;;  %s99_s9 = smov [#allocation2]   ;;  %s14_s8 = int_to_ptr.hbm [resolvable:$true] %s13_s8 }
   0x2   :  { %s15_s10 = sshll.u32 %s99_s9, 4  ;;  %s16_s10 = int_to_ptr.vmem [resolvable:$true] %s15_s10 }
   0x3   :  { %18 = dma.hbm_to_vmem [thread:$0]  %s14_s8, 128, %s16_s10, [#allocation3]  }
   0x4   :  { %95 = dma.done.wait [#allocation3], 128  }
   0x5   :  { %96 = vsyncadd [#allocation3], 4294967168  ;;  %v23_v0 = vld [vmem:[#allocation2] sm:$0xff]  ;;  %s100_s11 = smov 1   ;;  %s101_s12 = smov [#allocation5]  }
   0x6   :  { %24 = vrot.lane.b32.xlu0 %v23_v0, %s100_s11  ;;  %s32_s13 = sshll.u32 %s101_s12, 4  ;;  %s34_s16 = sshll.u32 %s119_s1, 4  ;;  %s33_s13 = int_to_ptr.vmem [resolvable:$true] %s32_s13  ;;  %s35_s16 = int_to_ptr.hbm [resolvable:$true] %s34_s16 }
  0x78   :  { %v25_v1 = vpop.permute.xlu0 %24 }
  0x79   :  { %26 = vst [vmem:[#allocation5] sm:$0xff] %v25_v1 }
  0x7a   :  { %37 = dma.vmem_to_hbm [thread:$0]  %s33_s13, 128, %s35_s16, [#allocation4]  }
  0x7b   :  { %97 = dma.done.wait [#allocation4], 128  }
  0x7c   :  { %98 = vsyncadd [#allocation4], 4294967168 }
  0x7d   :  { %42 = vsyncpa [#allocation3], 1 }
  0x7e   :  { %43 = vsyncpa [#allocation4], 1 }

</bundles_post_ra>
